<compile_context>
chip_gen: v5e
topology: v5e:2x2
jax: 0.10.0
libtpu: 0.0.40
codegen_flags: <defaults>
</compile_context>

<pallas_src>
import jax
import jax.numpy as jnp
from jax.experimental import pallas as pl
from jax.experimental.pallas import tpu as pltpu

_LANES = 128


def _round_up(v, m):
    return ((v + m - 1) // m) * m


def _pick_tiles(nc, hw, itemsize, target_bytes=4 << 20, thw_cap=4096):
    """Pick (row tile TR, spatial tile THW)."""
    # Spatial tile: multiple of 128 (aligned matmul K, lane-aligned DMA),
    # capped so the resident `ones` operand stays small (<= 2 MiB f32).
    thw = min(_round_up(hw, _LANES), thw_cap)

    # Row tile: full when small; otherwise a multiple of 128 (output-lane rule)
    # sized so each input buffer is ~target_bytes.
    if nc <= _LANES:
        tr = nc
    else:
        tr = (target_bytes // max(1, thw * itemsize)) // _LANES * _LANES
        tr = max(_LANES, min(512, tr))
        # Give v7x's second TensorCore at least 2 parallel row blocks.
        half = (nc // 2) // _LANES * _LANES
        if _LANES <= half < tr:
            tr = half
        if tr >= nc:
            tr = nc
    return tr, thw


def _make_gap_kernel(hw, thw, n_k, needs_mask):
    # Each of the 128 accumulator columns holds the full row sum, so divide by
    # (HW * 128) after the cross-lane reduce.
    scale = 1.0 / (float(hw) * float(_LANES))
    valid_tail = hw - (n_k - 1) * thw

    def _accum(x, ones, acc_ref):
        acc_ref[...] += jnp.dot(x, ones, preferred_element_type=jnp.float32)

    def kernel(x_ref, ones_ref, o_ref, acc_ref):
        k = pl.program_id(1)

        @pl.when(k == 0)
        def _():
            acc_ref[...] = jnp.zeros_like(acc_ref)

        if needs_mask:
            # Hot steps: plain MXU accumulate, no mask cost.
            @pl.when(k < n_k - 1)
            def _():
                _accum(x_ref[...], ones_ref[...], acc_ref)

            # Last step only: zero the padded spatial tail (in native dtype,
            # no f32 temp), then accumulate.
            @pl.when(k == n_k - 1)
            def _():
                x = x_ref[...]
                col = jax.lax.broadcasted_iota(jnp.int32, x.shape, 1)
                x = jnp.where(col < valid_tail, x, jnp.zeros_like(x))
                _accum(x, ones_ref[...], acc_ref)
        else:
            _accum(x_ref[...], ones_ref[...], acc_ref)

        @pl.when(k == n_k - 1)
        def _():
            total = jnp.sum(acc_ref[...], axis=-1, keepdims=True)   # (TR, 1)
            o_ref[...] = (total * scale).astype(o_ref.dtype)

    return kernel


def global_avg_pool2d(x):
    """x: (N, C, H, W) -> (N, C), mean over spatial dims (NCHW, like PyTorch)."""
    N, C, H, W = x.shape
    HW = H * W
    NC = N * C
    x2 = x.reshape(NC, HW)                                  # free reshape

    itemsize = jnp.dtype(x.dtype).itemsize
    TR, THW = _pick_tiles(NC, HW, itemsize)
    n_r = pl.cdiv(NC, TR)
    n_k = pl.cdiv(HW, THW)
    needs_mask = (HW % THW) != 0

    # Resident all-ones MXU operand (fetched once per core: constant index_map).
    ones = jnp.ones((THW, _LANES), dtype=x.dtype)

    cost = pl.CostEstimate(
        flops=int(2 * NC * HW * _LANES),
        transcendentals=0,
        bytes_accessed=int(NC * HW * itemsize + NC * itemsize),
    )

    out = pl.pallas_call(
        _make_gap_kernel(HW, THW, n_k, needs_mask),
        out_shape=jax.ShapeDtypeStruct((NC, 1), x.dtype),
        grid_spec=pltpu.PrefetchScalarGridSpec(
            num_scalar_prefetch=0,
            grid=(n_r, n_k),
            in_specs=[
                pl.BlockSpec((TR, THW), lambda r, k: (r, k)),
                pl.BlockSpec((THW, _LANES), lambda r, k: (0, 0)),
            ],
            out_specs=pl.BlockSpec((TR, 1), lambda r, k: (r, 0)),
            scratch_shapes=[pltpu.VMEM((TR, _LANES), jnp.float32)],
        ),
        compiler_params=pltpu.CompilerParams(
            dimension_semantics=("parallel", "arbitrary"),
            vmem_limit_bytes=32 * 1024 * 1024,
        ),
        cost_estimate=cost,
    )(x2, ones)

    return out.reshape(N, C)


if __name__ == "__main__":
    key = jax.random.PRNGKey(0)

    def _check(shape, dtype=jnp.float32, atol=1e-5, rtol=1e-4):
        k = jax.random.fold_in(key, sum(shape))
        x = jax.random.normal(k, shape, dtype=jnp.float32).astype(dtype)
        out = jax.block_until_ready(global_avg_pool2d(x))
        ref = jnp.mean(x.astype(jnp.float32), axis=(2, 3))
        assert out.shape == (shape[0], shape[1]), f"bad shape {out.shape}"
        assert jnp.allclose(out.astype(jnp.float32), ref, atol=atol, rtol=rtol), \
            f"mismatch for {shape} {dtype}"

    # Baseline small shape (single reduction step, full-row block).
    _check((2, 4, 16, 16))
    # Multi-step HW reduction (exercises the resident f32 accumulator over k).
    _check((2, 8, 128, 128))
    # N*C > 128 (multiple row blocks, partial last one) + HW not a multiple of
    # 128 (masked spatial tail on the final step).
    _check((1, 300, 50, 50))
    # bf16 path (native-dtype wire, MXU bf16 matmul, bf16 output cast).
    _check((2, 8, 64, 64), dtype=jnp.bfloat16, atol=1e-2, rtol=1e-2)

    print("KERNEL_OK")
</pallas_src>

<mosaic_0001>
module attributes {stable_mosaic.version = 11 : i64} {
  func.func @kernel(%arg0: i32, %arg1: i32, %arg2: memref<8x256xf32, #tpu.memory_space<vmem>>, %arg3: memref<256x128xf32, #tpu.memory_space<vmem>>, %arg4: memref<8x1xf32, #tpu.memory_space<vmem>>, %arg5: memref<8x128xf32, #tpu.memory_space<vmem>>) attributes {dimension_semantics = [#tpu.dimension_semantics<parallel>, #tpu.dimension_semantics<arbitrary>], iteration_bounds = array<i64: 1, 1>, scalar_prefetch = 0 : i64, scratch_operands = 1 : i64, tpu.core_type = #tpu.core_type<tc>, window_params = [{transform_indices = @transform_0, window_bounds = array<i64: 8, 256>}, {pipeline_mode = #tpu.pipeline_mode<synchronous>, transform_indices = @transform_1, window_bounds = array<i64: 256, 128>}, {transform_indices = @transform_2, window_bounds = array<i64: 8, 1>}]} {
    %c0_i32 = arith.constant 0 : i32
    %0 = arith.cmpi eq, %arg1, %c0_i32 : i32
    %1 = arith.extui %0 : i1 to i32
    %c0_i32_0 = arith.constant 0 : i32
    %2 = arith.cmpi ne, %1, %c0_i32_0 : i32
    scf.if %2 {
      %cst_10 = arith.constant 0.000000e+00 : f32
      %12 = vector.broadcast %cst_10 : f32 to vector<8x128xf32>
      %c0_11 = arith.constant 0 : index
      %c0_12 = arith.constant 0 : index
      %13 = vector.load %arg5[%c0_11, %c0_12] : memref<8x128xf32, #tpu.memory_space<vmem>>, vector<8x128xf32>
      tpu.vector_store %arg5[%c0_11, %c0_12], %12 {strides = array<i32>} : memref<8x128xf32, #tpu.memory_space<vmem>>, vector<8x128xf32>,
    } else {
    }
    %c0 = arith.constant 0 : index
    %c0_1 = arith.constant 0 : index
    %3 = vector.load %arg2[%c0, %c0_1] : memref<8x256xf32, #tpu.memory_space<vmem>>, vector<8x256xf32>
    %c0_2 = arith.constant 0 : index
    %c0_3 = arith.constant 0 : index
    %4 = vector.load %arg3[%c0_2, %c0_3] : memref<256x128xf32, #tpu.memory_space<vmem>>, vector<256x128xf32>
    %c0_4 = arith.constant 0 : index
    %c0_5 = arith.constant 0 : index
    %5 = vector.load %arg5[%c0_4, %c0_5] : memref<8x128xf32, #tpu.memory_space<vmem>>, vector<8x128xf32>
    %cst = arith.constant dense<0.000000e+00> : vector<8x128xf32>
    %6 = tpu.matmul %3, %4, %cst {dimension_numbers = #tpu.dot_dimension_numbers<[1], [0], [0], [1], [0, 0, 1, 1], [], []>} : vector<8x256xf32>, vector<256x128xf32>, vector<8x128xf32> -> vector<8x128xf32>
    %7 = arith.addf %5, %6 : vector<8x128xf32>
    %c0_6 = arith.constant 0 : index
    %c0_7 = arith.constant 0 : index
    %8 = vector.load %arg5[%c0_6, %c0_7] : memref<8x128xf32, #tpu.memory_space<vmem>>, vector<8x128xf32>
    tpu.vector_store %arg5[%c0_6, %c0_7], %7 {strides = array<i32>} : memref<8x128xf32, #tpu.memory_space<vmem>>, vector<8x128xf32>,
    %c0_i32_8 = arith.constant 0 : i32
    %9 = arith.cmpi eq, %arg1, %c0_i32_8 : i32
    %10 = arith.extui %9 : i1 to i32
    %c0_i32_9 = arith.constant 0 : i32
    %11 = arith.cmpi ne, %10, %c0_i32_9 : i32
    scf.if %11 {
      %c0_10 = arith.constant 0 : index
      %c0_11 = arith.constant 0 : index
      %12 = vector.load %arg5[%c0_10, %c0_11] : memref<8x128xf32, #tpu.memory_space<vmem>>, vector<8x128xf32>
      %cst_12 = arith.constant dense<0.000000e+00> : vector<8xf32>
      %13 = vector.multi_reduction <add>, %12, %cst_12 [1] : vector<8x128xf32> to vector<8xf32>
      %14 = vector.shape_cast %13 : vector<8xf32> to vector<8x1xf32>
      %cst_13 = arith.constant 3.05175781E-5 : f32
      %15 = vector.broadcast %cst_13 : f32 to vector<8x1xf32>
      %16 = arith.mulf %14, %15 : vector<8x1xf32>
      %c0_14 = arith.constant 0 : index
      %c0_15 = arith.constant 0 : index
      %17 = vector.load %arg4[%c0_14, %c0_15] : memref<8x1xf32, #tpu.memory_space<vmem>>, vector<8x1xf32>
      tpu.vector_store %arg4[%c0_14, %c0_15], %16 {strides = array<i32>} : memref<8x1xf32, #tpu.memory_space<vmem>>, vector<8x1xf32>,
    } else {
    }
    return
  }
  func.func @transform_0(%arg0: i32, %arg1: i32) -> (i32, i32) {
    %c0_i32 = arith.constant 0 : i32
    return %arg0, %arg1 : i32, i32
  }
  func.func @transform_1(%arg0: i32, %arg1: i32) -> (i32, i32) {
    %c0_i32 = arith.constant 0 : i32
    %c0_i32_0 = arith.constant 0 : i32
    %c0_i32_1 = arith.constant 0 : i32
    return %c0_i32, %c0_i32_0 : i32, i32
  }
  func.func @transform_2(%arg0: i32, %arg1: i32) -> (i32, i32) {
    %c0_i32 = arith.constant 0 : i32
    %c0_i32_0 = arith.constant 0 : i32
    return %arg0, %c0_i32 : i32, i32
  }
}

</mosaic_0001>

<bundles_post_ra>
// kernel: tpu_custom_call.1
= control target key start
LH: loop header
LB: loop body
LE: loop exit
PB: predicated region body
PF: predicated region fallthrough
CT: control target
= control target key end

     0   :  { %7 = vsyncpa [#allocation4], 0  ;;  %s222_s0 = inlined_call_operand.hbm [shape: f32[8,256], index: 0, kind: input, shape index: {}]   ;;  %s223_s1 = inlined_call_operand.hbm [shape: f32[256,128], index: 1, kind: input, shape index: {}]   ;;  %s224_s2 = inlined_call_operand.vmem [shape: f32[8,1], index: 2, kind: output, shape index: {}]  }
   0x1   :  { %s14_s11 = sshll.u32 %s222_s0, 4  ;;  %s15_s11 = int_to_ptr.hbm [resolvable:$true] %s14_s11 }
   0x2   :  { %8 = vsyncpa [#allocation6], 0  ;;  %s194_s12 = smov [#allocation3]   ;;  %s24_s16 = sshll.u32 %s223_s1, 4  ;;  %s25_s16 = int_to_ptr.hbm [resolvable:$true] %s24_s16 }
   0x3   :  { %s16_s13 = sshll.u32 %s194_s12, 4  ;;  %s195_s17 = smov [#allocation5]   ;;  %s17_s13 = int_to_ptr.vmem [resolvable:$true] %s16_s13 }
   0x4   :  { %19 = dma.hbm_to_vmem [thread:$0]  %s15_s11, 256, %s17_s13, [#allocation4]  }
   0x5   :  { %s26_s18 = sshll.u32 %s195_s17, 4  ;;  %s196_s19 = smov 128   ;;  %s27_s18 = int_to_ptr.vmem [resolvable:$true] %s26_s18 }
   0x6   :  { %s197_s20 = smov 8  }
   0x7   :  { %32 = dma.hbm_to_vmem [thread:$0]  %s25_s16, 4096, %s27_s18, [#allocation6], %s196_s19, %s196_s19, %s197_s20  }
   0x8   :  { %190 = dma.done.wait [#allocation4], 256  }
   0x9   :  { %191 = vsyncadd [#allocation4], 4294967040 }
   0xa   :  { %192 = dma.done.wait [#allocation6], 4096  }
   0xb   :  { %193 = vsyncadd [#allocation6], 4294963200  ;;  %v63_v0 = vld [vmem:[#allocation5 + $0x78] sm:$0xff]  ;;  %v62_v2 = vld [vmem:[#allocation5 + $0x70] sm:$0xff]  ;;  %vm130_vm0 = vcmask 7168  }
   0xc   :  { %v79_v1 = vld [vmem:[#allocation5 + $0xf8] sm:$0xff]  ;;  %81 = vmatpush.msra.mxu0 %v63_v0  ;;  %v78_v3 = vld [vmem:[#allocation5 + $0xf0] sm:$0xff]  ;;  %v61_v4 = vld [vmem:[#allocation5 + $0x68] sm:$0xff] }
   0xd   :  { %101 = vmatpush.msra.mxu1 %v79_v1  ;;  %v77_v5 = vld [vmem:[#allocation5 + $0xe8] sm:$0xff]  ;;  %v60_v6 = vld [vmem:[#allocation5 + $0x60] sm:$0xff]  ;;  %v59_v8 = vld [vmem:[#allocation5 + $0x58] sm:$0xff] }
   0xe   :  { %82 = vmatpush.msra.mxu0 %v62_v2  ;;  %v76_v7 = vld [vmem:[#allocation5 + $0xe0] sm:$0xff]  ;;  %v75_v9 = vld [vmem:[#allocation5 + $0xd8] sm:$0xff]  ;;  %v58_v10 = vld [vmem:[#allocation5 + $0x50] sm:$0xff] }
   0xf   :  { %102 = vmatpush.msra.mxu1 %v78_v3  ;;  %v74_v11 = vld [vmem:[#allocation5 + $0xd0] sm:$0xff]  ;;  %v57_v12 = vld [vmem:[#allocation5 + $0x48] sm:$0xff]  ;;  %v56_v14 = vld [vmem:[#allocation5 + $0x40] sm:$0xff] }
  0x10   :  { %83 = vmatpush.msra.mxu0 %v61_v4  ;;  %v73_v13 = vld [vmem:[#allocation5 + $0xc8] sm:$0xff]  ;;  %v72_v15 = vld [vmem:[#allocation5 + $0xc0] sm:$0xff]  ;;  %v55_v16 = vld [vmem:[#allocation5 + $0x38] sm:$0xff] }
  0x11   :  { %103 = vmatpush.msra.mxu1 %v77_v5  ;;  %v71_v17 = vld [vmem:[#allocation5 + $0xb8] sm:$0xff]  ;;  %v54_v18 = vld [vmem:[#allocation5 + $0x30] sm:$0xff]  ;;  %v53_v20 = vld [vmem:[#allocation5 + $0x28] sm:$0xff] }
  0x12   :  { %84 = vmatpush.msra.mxu0 %v60_v6  ;;  %v70_v19 = vld [vmem:[#allocation5 + $0xb0] sm:$0xff]  ;;  %v69_v21 = vld [vmem:[#allocation5 + $0xa8] sm:$0xff]  ;;  %v52_v22 = vld [vmem:[#allocation5 + $0x20] sm:$0xff] }
  0x13   :  { %104 = vmatpush.msra.mxu1 %v76_v7  ;;  %v68_v23 = vld [vmem:[#allocation5 + $0xa0] sm:$0xff]  ;;  %v51_v24 = vld [vmem:[#allocation5 + $0x18] sm:$0xff]  ;;  %v50_v26 = vld [vmem:[#allocation5 + $0x10] sm:$0xff] }
  0x14   :  { %85 = vmatpush.msra.mxu0 %v59_v8  ;;  %v67_v25 = vld [vmem:[#allocation5 + $0x98] sm:$0xff]  ;;  %v66_v27 = vld [vmem:[#allocation5 + $0x90] sm:$0xff]  ;;  %v49_v28 = vld [vmem:[#allocation5 + $0x8] sm:$0xff] }
  0x15   :  { %105 = vmatpush.msra.mxu1 %v75_v9  ;;  %v65_v29 = vld [vmem:[#allocation5 + $0x88] sm:$0xff]  ;;  %v48_v30 = vld [vmem:[#allocation5] sm:$0xff]  ;;  %v46_v32 = vld [vmem:[#allocation3] sm:$0xff] }
  0x16   :  { %86 = vmatpush.msra.mxu0 %v58_v10  ;;  %v64_v31 = vld [vmem:[#allocation5 + $0x80] sm:$0xff]  ;;  %v47_v33 = vld [vmem:[#allocation3 + $0x8] sm:$0xff] }
  0x17   :  { %106 = vmatpush.msra.mxu1 %v74_v11 }
  0x18   :  { %87 = vmatpush.msra.mxu0 %v57_v12 }
  0x19   :  { %107 = vmatpush.msra.mxu1 %v73_v13 }
  0x1a   :  { %88 = vmatpush.msra.mxu0 %v56_v14 }
  0x1b   :  { %108 = vmatpush.msra.mxu1 %v72_v15 }
  0x1c   :  { %89 = vmatpush.msra.mxu0 %v55_v16 }
  0x1d   :  { %109 = vmatpush.msra.mxu1 %v71_v17 }
  0x1e   :  { %90 = vmatpush.msra.mxu0 %v54_v18 }
  0x1f   :  { %110 = vmatpush.msra.mxu1 %v70_v19 }
  0x20   :  { %91 = vmatpush.msra.mxu0 %v53_v20 }
  0x21   :  { %111 = vmatpush.msra.mxu1 %v69_v21 }
  0x22   :  { %92 = vmatpush.msra.mxu0 %v52_v22 }
  0x23   :  { %112 = vmatpush.msra.mxu1 %v68_v23 }
  0x24   :  { %93 = vmatpush.msra.mxu0 %v51_v24 }
  0x25   :  { %113 = vmatpush.msra.mxu1 %v67_v25 }
  0x26   :  { %94 = vmatpush.msra.mxu0 %v50_v26 }
  0x27   :  { %114 = vmatpush.msra.mxu1 %v66_v27 }
  0x28   :  { %95 = vmatpush.msra.mxu0 %v49_v28 }
  0x29   :  { %115 = vmatpush.msra.mxu1 %v65_v29 }
  0x2a   :  { %96 = vmatpush.msra.mxu0 %v48_v30 }
  0x2b   :  { %116 = vmatpush.msra.mxu1 %v64_v31  ;;  %97 = vmatmul.f32.vlgmr.msra.gmra.mxu0 %v46_v32 }
  0x2c   :  { %117 = vmatmul.f32.vlgmr.msra.gmra.mxu1 %v47_v33 }
  0xa8   :  { %v98_v34 = vpop.f32.mrf.mxu0 }
  0xa9   :  { %v118_v35 = vpop.f32.mrf.mxu1 }
  0xaa   :  { %v119_v36 = vadd.f32 %v118_v35, %v98_v34 }
  0xac   :  { %127 = vadd.xlane.f32.xlu0 %v119_v36 }
 0x11f   :  { %v128_v37 = vpop.xlane.xlu0 %127 }
 0x120   :  { %v129_v38 = vmul.f32 3.0517578e-05, %v128_v37 }
 0x122   :  { %131 = vst.msk [vmem:[%s224_s2] sm:$0xff] %vm130_vm0, %v129_v38 }
 0x123   :  { %136 = vsyncpa [#allocation4], 1 }
 0x124   :  { %137 = vsyncpa [#allocation6], 1 }

</bundles_post_ra>
